<compile_context>
chip_gen: v6e
topology: v6e:2x2x1
jax: 0.10.0
libtpu: 0.0.40
codegen_flags: <defaults>
</compile_context>

<pallas_src>
import jax
import jax.numpy as jnp
from jax.experimental import pallas as pl
from jax.experimental.pallas import tpu as pltpu


def _cbam_kernel(x_ref, w1_ref, w2_ref, cm_ref, bias_ref, o_ref):
    """One grid step processes a (Bt, C, H*W) lane-dense block."""
    Bt, C, HW = x_ref.shape

    x = x_ref[...].astype(jnp.float32)                       # (Bt, C, HW)

    # ---------------- channel attention ----------------
    avg = jnp.sum(x, axis=2) * (1.0 / HW)                    # (Bt, C)
    mx = jnp.max(x, axis=2)                                  # (Bt, C)
    pooled = jnp.concatenate([avg, mx], axis=0)              # (2*Bt, C)
    h = jnp.maximum(
        jnp.dot(pooled, w1_ref[...], preferred_element_type=jnp.float32), 0.0)
    y = jnp.dot(h, w2_ref[...], preferred_element_type=jnp.float32)
    ca = jax.nn.sigmoid(y[:Bt, :] + y[Bt:, :])               # (Bt, C)

    # ---------------- channel gate (vectorized) ----------------
    gated = x * ca[:, :, None]                               # (Bt, C, HW)

    # ---------------- spatial attention: one fused matmul ----------------
    mean_c = jnp.sum(gated, axis=1) * (1.0 / C)              # (Bt, HW)
    max_c = jnp.max(gated, axis=1)                           # (Bt, HW)
    cat = jnp.concatenate([mean_c, max_c], axis=1)           # (Bt, 2*HW)
    conv = jnp.dot(cat, cm_ref[...],
                   preferred_element_type=jnp.float32)       # (Bt, HW)
    sa = jax.nn.sigmoid(conv + bias_ref[0])                  # (Bt, HW)

    # ---------------- gated output: single lane-dense store ----------------
    o_ref[...] = (gated * sa[:, None, :]).astype(o_ref.dtype)


def _build_conv_matrix(conv_w, H, W):
    """Fold the 7x7 SAME cross-correlation (in channels: [mean, max]) into a
    (2*H*W, H*W) matrix so the spatial conv becomes one MXU matmul on the
    flattened lane-dense axis.

    M[ci*HW + hi*W + wi, ho*W + wo] = conv_w[ci, hi-ho+3, wi-wo+3]
    (zero when either offset is outside the 7-tap window).
    """
    HW = H * W
    dh = jnp.arange(H)[:, None] - jnp.arange(H)[None, :] + 3     # (H_in, H_out)
    dw = jnp.arange(W)[:, None] - jnp.arange(W)[None, :] + 3     # (W_in, W_out)
    vh = (dh >= 0) & (dh < 7)
    vw = (dw >= 0) & (dw < 7)
    k = conv_w.astype(jnp.float32)                               # (2, 7, 7)
    m = k[:, jnp.clip(dh, 0, 6)[:, None, :, None],
          jnp.clip(dw, 0, 6)[None, :, None, :]]                  # (2,H,W,H,W)
    mask = (vh[:, None, :, None] & vw[None, :, None, :]).astype(jnp.float32)
    m = m * mask[None]
    return m.reshape(2 * HW, HW)


def _pick_block_b(B, C, HW, itemsize):
    """Images per grid step.

    Target a few MiB per input block so the double-buffered in+out blocks stay
    comfortably inside v7x's 64 MiB VMEM, while keeping >= 2 grid steps so the
    BlockSpec pipeline overlaps DMA with compute (and both v7x TensorCores get
    work under dimension_semantics=("parallel",)).
    """
    per_image = C * HW * max(itemsize, 4)        # kernel computes in f32
    target = 4 << 20
    bt = max(1, min(B, target // max(per_image, 1)))
    if B >= 2:
        bt = min(bt, max(B // 2, 1))             # keep at least 2 grid steps
    while B % bt:
        bt -= 1
    return bt


def cbam_pallas(x, w1, w2, conv_w, conv_b):
    """CBAM forward.  x: (B, C, H, W) NCHW.  w1: (C, C//r), w2: (C//r, C),
    conv_w: (2, 7, 7) [in-channel order: mean, max], conv_b: (1,)."""
    B, C, H, W = x.shape
    HW = H * W
    hidden = w1.shape[1]
    assert w1.shape == (C, hidden) and w2.shape == (hidden, C)
    assert conv_w.shape == (2, 7, 7) and conv_b.shape == (1,)
    # Dense conv-matrix form is intended for CBAM-sized feature maps; for very
    # large H*W switch to the banded (14*W, W) Toeplitz variant.
    assert 2 * HW * HW * 4 <= (8 << 20), "feature map too large for dense conv matrix"

    bt = _pick_block_b(B, C, HW, x.dtype.itemsize)
    cm = _build_conv_matrix(conv_w, H, W)                        # (2*HW, HW)

    x_flat = x.reshape(B, C, HW)                                 # free reshape
    out_flat = pl.pallas_call(
        _cbam_kernel,
        out_shape=jax.ShapeDtypeStruct((B, C, HW), x.dtype),
        grid=(B // bt,),
        in_specs=[
            pl.BlockSpec((bt, C, HW), lambda b: (b, 0, 0)),
            pl.BlockSpec((C, hidden), lambda b: (0, 0)),
            pl.BlockSpec((hidden, C), lambda b: (0, 0)),
            pl.BlockSpec((2 * HW, HW), lambda b: (0, 0)),
            pl.BlockSpec(memory_space=pltpu.MemorySpace.SMEM),   # conv bias
        ],
        out_specs=pl.BlockSpec((bt, C, HW), lambda b: (b, 0, 0)),
        compiler_params=pltpu.CompilerParams(
            dimension_semantics=("parallel",),
            vmem_limit_bytes=32 * 1024 * 1024),
    )(x_flat, w1.astype(jnp.float32), w2.astype(jnp.float32), cm,
      conv_b.astype(jnp.float32))
    return out_flat.reshape(B, C, H, W)


def cbam_reference(x_nchw, w1, w2, conv_w, conv_b):
    """Pure-JAX reference matching the PyTorch CBAM forward."""
    x = jnp.transpose(x_nchw, (0, 2, 3, 1)).astype(jnp.float32)  # NHWC
    avg = jnp.mean(x, axis=(1, 2))
    mx = jnp.max(x, axis=(1, 2))

    def mlp(v):
        return jnp.maximum(v @ w1, 0.0) @ w2

    ca = jax.nn.sigmoid(mlp(avg) + mlp(mx))                      # (B, C)
    out1 = x * ca[:, None, None, :]

    mean_c = jnp.mean(out1, axis=3, keepdims=True)
    max_c = jnp.max(out1, axis=3, keepdims=True)
    cat = jnp.concatenate([mean_c, max_c], axis=3)               # (B, H, W, 2)
    w_hwio = jnp.transpose(conv_w, (1, 2, 0))[:, :, :, None]     # (7, 7, 2, 1)
    conv = jax.lax.conv_general_dilated(
        cat, w_hwio, (1, 1), "SAME",
        dimension_numbers=("NHWC", "HWIO", "NHWC")) + conv_b
    sa = jax.nn.sigmoid(conv)
    out = out1 * sa
    return jnp.transpose(out, (0, 3, 1, 2)).astype(x_nchw.dtype)


if __name__ == "__main__":
    B, C, H, W = 4, 32, 16, 16
    ratio = 16
    hidden = C // ratio

    key = jax.random.PRNGKey(0)
    k1, k2, k3, k4, kx = jax.random.split(key, 5)
    # Deterministic synthetic parameters (module __init__ shapes, no checkpoint)
    w1 = jax.random.normal(k1, (C, hidden), jnp.float32) * 0.1   # 1x1 conv C -> C//r
    w2 = jax.random.normal(k2, (hidden, C), jnp.float32) * 0.1   # 1x1 conv C//r -> C
    conv_w = jax.random.normal(k3, (2, 7, 7), jnp.float32) * 0.1 # 7x7 conv, 2 -> 1
    conv_b = jax.random.normal(k4, (1,), jnp.float32) * 0.1
    x = jax.random.normal(kx, (B, C, H, W), jnp.float32)

    out = jax.block_until_ready(cbam_pallas(x, w1, w2, conv_w, conv_b))
    ref = jax.block_until_ready(cbam_reference(x, w1, w2, conv_w, conv_b))

    assert out.shape == (B, C, H, W)
    assert out.dtype == x.dtype
    err = float(jnp.max(jnp.abs(out.astype(jnp.float32) - ref.astype(jnp.float32))))
    assert err < 1e-3, f"mismatch vs reference: {err}"
    print("KERNEL_OK")
</pallas_src>

<mosaic_0001>
module attributes {stable_mosaic.version = 11 : i64} {
  func.func @_cbam_kernel(%arg0: i32, %arg1: memref<2x32x256xf32, #tpu.memory_space<vmem>>, %arg2: memref<32x2xf32, #tpu.memory_space<vmem>>, %arg3: memref<2x32xf32, #tpu.memory_space<vmem>>, %arg4: memref<512x256xf32, #tpu.memory_space<vmem>>, %arg5: memref<1xf32, #tpu.memory_space<smem>>, %arg6: memref<2x32x256xf32, #tpu.memory_space<vmem>>) attributes {dimension_semantics = [#tpu.dimension_semantics<parallel>], iteration_bounds = array<i64: 2>, scalar_prefetch = 0 : i64, scratch_operands = 0 : i64, tpu.core_type = #tpu.core_type<tc>, window_params = [{transform_indices = @transform_0, window_bounds = array<i64: 2, 32, 256>}, {pipeline_mode = #tpu.pipeline_mode<synchronous>, transform_indices = @transform_1, window_bounds = array<i64: 32, 2>}, {pipeline_mode = #tpu.pipeline_mode<synchronous>, transform_indices = @transform_2, window_bounds = array<i64: 2, 32>}, {pipeline_mode = #tpu.pipeline_mode<synchronous>, transform_indices = @transform_3, window_bounds = array<i64: 512, 256>}, {transform_indices = @transform_4, window_bounds = array<i64: 1>}, {transform_indices = @transform_5, window_bounds = array<i64: 2, 32, 256>}]} {
    %c0 = arith.constant 0 : index
    %c0_0 = arith.constant 0 : index
    %c0_1 = arith.constant 0 : index
    %0 = vector.load %arg1[%c0, %c0_0, %c0_1] : memref<2x32x256xf32, #tpu.memory_space<vmem>>, vector<2x32x256xf32>
    %cst = arith.constant dense<0.000000e+00> : vector<2x32xf32>
    %1 = vector.multi_reduction <add>, %0, %cst [2] : vector<2x32x256xf32> to vector<2x32xf32>
    %cst_2 = arith.constant 3.906250e-03 : f32
    %2 = vector.broadcast %cst_2 : f32 to vector<2x32xf32>
    %3 = arith.mulf %1, %2 : vector<2x32xf32>
    %cst_3 = arith.constant dense<0xFF800000> : vector<2x32xf32>
    %4 = vector.multi_reduction <maximumf>, %0, %cst_3 [2] : vector<2x32x256xf32> to vector<2x32xf32>
    %5 = tpu.concatenate %3, %4 in 0 : vector<2x32xf32>, vector<2x32xf32> -> vector<4x32xf32>
    %c0_4 = arith.constant 0 : index
    %c0_5 = arith.constant 0 : index
    %6 = vector.load %arg2[%c0_4, %c0_5] : memref<32x2xf32, #tpu.memory_space<vmem>>, vector<32x2xf32>
    %cst_6 = arith.constant dense<0.000000e+00> : vector<4x2xf32>
    %7 = tpu.matmul %5, %6, %cst_6 {dimension_numbers = #tpu.dot_dimension_numbers<[1], [0], [0], [1], [0, 0, 1, 1], [], []>} : vector<4x32xf32>, vector<32x2xf32>, vector<4x2xf32> -> vector<4x2xf32>
    %cst_7 = arith.constant 0.000000e+00 : f32
    %8 = vector.broadcast %cst_7 : f32 to vector<4x2xf32>
    %9 = arith.maximumf %7, %8 : vector<4x2xf32>
    %c0_8 = arith.constant 0 : index
    %c0_9 = arith.constant 0 : index
    %10 = vector.load %arg3[%c0_8, %c0_9] : memref<2x32xf32, #tpu.memory_space<vmem>>, vector<2x32xf32>
    %cst_10 = arith.constant dense<0.000000e+00> : vector<4x32xf32>
    %11 = tpu.matmul %9, %10, %cst_10 {dimension_numbers = #tpu.dot_dimension_numbers<[1], [0], [0], [1], [0, 0, 1, 1], [], []>} : vector<4x2xf32>, vector<2x32xf32>, vector<4x32xf32> -> vector<4x32xf32>
    %12 = vector.extract_strided_slice %11 {offsets = [0, 0], sizes = [2, 32], strides = [1, 1]} : vector<4x32xf32> to vector<2x32xf32>
    %13 = vector.extract_strided_slice %11 {offsets = [2, 0], sizes = [2, 32], strides = [1, 1]} : vector<4x32xf32> to vector<2x32xf32>
    %14 = arith.addf %12, %13 : vector<2x32xf32>
    %15 = arith.negf %14 : vector<2x32xf32>
    %16 = math.exp %15 : vector<2x32xf32>
    %cst_11 = arith.constant 1.000000e+00 : f32
    %17 = vector.broadcast %cst_11 : f32 to vector<2x32xf32>
    %18 = arith.addf %17, %16 : vector<2x32xf32>
    %19 = arith.divf %17, %18 : vector<2x32xf32>
    %20 = vector.shape_cast %19 : vector<2x32xf32> to vector<2x32x1xf32>
    %21 = vector.broadcast %20 : vector<2x32x1xf32> to vector<2x32x256xf32>
    %22 = arith.mulf %0, %21 : vector<2x32x256xf32>
    %cst_12 = arith.constant dense<0.000000e+00> : vector<2x256xf32>
    %23 = vector.multi_reduction <add>, %22, %cst_12 [1] : vector<2x32x256xf32> to vector<2x256xf32>
    %cst_13 = arith.constant 3.125000e-02 : f32
    %24 = vector.broadcast %cst_13 : f32 to vector<2x256xf32>
    %25 = arith.mulf %23, %24 : vector<2x256xf32>
    %cst_14 = arith.constant dense<0xFF800000> : vector<2x256xf32>
    %26 = vector.multi_reduction <maximumf>, %22, %cst_14 [1] : vector<2x32x256xf32> to vector<2x256xf32>
    %27 = tpu.concatenate %25, %26 in 1 : vector<2x256xf32>, vector<2x256xf32> -> vector<2x512xf32>
    %c0_15 = arith.constant 0 : index
    %c0_16 = arith.constant 0 : index
    %28 = vector.load %arg4[%c0_15, %c0_16] : memref<512x256xf32, #tpu.memory_space<vmem>>, vector<512x256xf32>
    %cst_17 = arith.constant dense<0.000000e+00> : vector<2x256xf32>
    %29 = tpu.matmul %27, %28, %cst_17 {dimension_numbers = #tpu.dot_dimension_numbers<[1], [0], [0], [1], [0, 0, 1, 1], [], []>} : vector<2x512xf32>, vector<512x256xf32>, vector<2x256xf32> -> vector<2x256xf32>
    %c0_18 = arith.constant 0 : index
    %30 = memref.load %arg5[%c0_18] : memref<1xf32, #tpu.memory_space<smem>>
    %31 = vector.broadcast %30 : f32 to vector<2x256xf32>
    %32 = arith.addf %29, %31 : vector<2x256xf32>
    %33 = arith.negf %32 : vector<2x256xf32>
    %34 = math.exp %33 : vector<2x256xf32>
    %cst_19 = arith.constant 1.000000e+00 : f32
    %35 = vector.broadcast %cst_19 : f32 to vector<2x256xf32>
    %36 = arith.addf %35, %34 : vector<2x256xf32>
    %37 = arith.divf %35, %36 : vector<2x256xf32>
    %38 = vector.shape_cast %37 : vector<2x256xf32> to vector<2x1x256xf32>
    %39 = vector.broadcast %38 : vector<2x1x256xf32> to vector<2x32x256xf32>
    %40 = arith.mulf %22, %39 : vector<2x32x256xf32>
    %c0_20 = arith.constant 0 : index
    %c0_21 = arith.constant 0 : index
    %c0_22 = arith.constant 0 : index
    %41 = vector.load %arg6[%c0_20, %c0_21, %c0_22] : memref<2x32x256xf32, #tpu.memory_space<vmem>>, vector<2x32x256xf32>
    tpu.vector_store %arg6[%c0_20, %c0_21, %c0_22], %40 {strides = array<i32>} : memref<2x32x256xf32, #tpu.memory_space<vmem>>, vector<2x32x256xf32>,
    return
  }
  func.func @transform_0(%arg0: i32) -> (i32, i32, i32) {
    %c0_i32 = arith.constant 0 : i32
    %c0_i32_0 = arith.constant 0 : i32
    %c0_i32_1 = arith.constant 0 : i32
    return %arg0, %c0_i32, %c0_i32_0 : i32, i32, i32
  }
  func.func @transform_1(%arg0: i32) -> (i32, i32) {
    %c0_i32 = arith.constant 0 : i32
    %c0_i32_0 = arith.constant 0 : i32
    %c0_i32_1 = arith.constant 0 : i32
    return %c0_i32, %c0_i32_0 : i32, i32
  }
  func.func @transform_2(%arg0: i32) -> (i32, i32) {
    %c0_i32 = arith.constant 0 : i32
    %c0_i32_0 = arith.constant 0 : i32
    %c0_i32_1 = arith.constant 0 : i32
    return %c0_i32, %c0_i32_0 : i32, i32
  }
  func.func @transform_3(%arg0: i32) -> (i32, i32) {
    %c0_i32 = arith.constant 0 : i32
    %c0_i32_0 = arith.constant 0 : i32
    %c0_i32_1 = arith.constant 0 : i32
    return %c0_i32, %c0_i32_0 : i32, i32
  }
  func.func @transform_4(%arg0: i32) -> i32 {
    %c0_i32 = arith.constant 0 : i32
    %c0_i32_0 = arith.constant 0 : i32
    return %c0_i32 : i32
  }
  func.func @transform_5(%arg0: i32) -> (i32, i32, i32) {
    %c0_i32 = arith.constant 0 : i32
    %c0_i32_0 = arith.constant 0 : i32
    %c0_i32_1 = arith.constant 0 : i32
    return %arg0, %c0_i32, %c0_i32_0 : i32, i32, i32
  }
}

</mosaic_0001>

<bundles_post_ra>
// kernel: tpu_custom_call.1
= control target key start
LH: loop header
LB: loop body
LE: loop exit
PB: predicated region body
PF: predicated region fallthrough
CT: control target
= control target key end

     0   :  { %s1926_s0 = inlined_call_operand.hbm [shape: f32[4,32,256], index: 0, kind: input, shape index: {}]   ;;  %s1927_s1 = inlined_call_operand.vmem [shape: f32[32,2], index: 1, kind: input, shape index: {}]   ;;  %s1928_s2 = inlined_call_operand.vmem [shape: f32[2,32], index: 2, kind: input, shape index: {}]   ;;  %s1929_s3 = inlined_call_operand.hbm [shape: f32[512,256], index: 3, kind: input, shape index: {}]   ;;  %s1930_s4 = inlined_call_operand.<no memory space> [shape: f32[1], index: 4, kind: input, shape index: {}]   ;;  %s1931_s5 = inlined_call_operand.hbm [shape: f32[4,32,256], index: 5, kind: output, shape index: {}]  }
   0x1   :  { %10 = sst [smem:[#allocation2]] %s1930_s4 }
   0x2   :  { %11 = vsyncpa [#allocation4], 0 }
   0x3   :  { %13 = vsyncpa [#allocation4 + $0x1], 0 }
   0x4   :  { %14 = vsyncpa [#allocation7], 0 }
   0x5   :  { %15 = vsyncpa [#allocation5], 0 }
   0x6   :  { %17 = vsyncpa [#allocation5 + $0x1], 0  ;;  %s1508_s20 = smov 0   ;;  %s1510_s21 = smov 0  }
   0x7   :  { %s1512_s22 = smov 0   ;;  %s1514_s23 = smov 0  }
   0x8 LB: > { %s1529_s4 = sadd.s32 4294967295, %s1463_s23   ;;  %s1214_s24 = sadd.s32 4294967294, %s1463_s23   ;;  %s1463_s23 = sphi %s1514_s23, %s1953_s23   ;;  %s1459_s22 = sphi %s1512_s22, %s1952_s22   ;;  %s1455_s21 = sphi %s1510_s21, %s1951_s21   ;;  %s1451_s20 = sphi %s1508_s20, %s1950_s20  }
   0x9   : > { %p43_p0 = scmp.ne.s32.totalorder %s1455_s21, %s1451_s20  ;;  %p1932_p1 = scmp.eq.s32.totalorder %s1529_s4, 0 }
   0xa   : > { %p157_p3 = scmp.eq.s32.totalorder %s1214_s24, 1  ;;  %p1215_p5 = scmp.ge.s32.totalorder %s1463_s23, 1 }
   0xb   : > { %p1538_p4 = por %p1932_p1, %p43_p0  ;;  %p164_p7 = scmp.lt.s32.totalorder %s1463_s23, 3 }
   0xc   : > { %p1543_p6 = por %p157_p3, %p43_p0  ;;  %s1465_s28 = smov [#allocation6]  }
   0xd   : > { %s1936_s25 = scalar_select %p1538_p4, 1, 0 }
   0xe   : > { %s1937_s26 = scalar_select %p1543_p6, 1, 0 }
   0xf   : > { %p1548_p8 = pnand %p1215_p5, %p164_p7  ;;  %s182_s29 = sshll.u32 %s1465_s28, 4  ;;  %s183_s29 = int_to_ptr.vmem [resolvable:$true] %s182_s29 }
  0x10   : > { %s1562_s6 = sadd.s32 1, %s1463_s23   ;;  %s30_s7 = sadd.s32 1, %s1459_s22 }
  0x11   : > { %s1938_s27 = scalar_select %p1548_p8, 1, 0 }
  0x12   : > { %p1273_p9 = pneg %p1548_p8  ;;  %s27_s8 = ssub.s32 %s1463_s23, %s1562_s6 }
  0x13   : > { %s1352_s9 = scalar_lea.vmem %s183_s29, 16384  ;;  %p1360_p5 = scmp.lt.s32.totalorder %s183_s29, %s183_s29 }
  0x14   : > { %p1557_p11 = pnand %p1273_p9, %p1932_p1  ;;  %p1353_p13 = scmp.ne.s32.totalorder %s183_s29, %s1352_s9 }
  0x15   : > { %p1361_p7 = scmp.lt.s32.totalorder %s1352_s9, %s1352_s9 }
  0x16   : > { %p1343_p12 = pneg %p1557_p11 }
  0x17   : > { %p1362_p10 = por %p1361_p7, %p1360_p5 }
  0x18   : > { %p1355_p0 = pnand %p1353_p13, %p1343_p12 }
  0x1a   : > { %p1356_p3 = pneg %p1355_p0 }
  0x1c   : > { %p1363_p2 = pnand %p1362_p10, %p1356_p3 }
  0x1e   : > { %1366 = shalt.err (!%p1363_p2)
}
  0x1f   : > { %s1466_s10 = smov 256   ;;  %s1467_s11 = smov 16  }
  0x20   : > { %1276 = dma.hbm_to_vmem [thread:$0]  (!%p1557_p11), %s1929_s3, 16384, %s183_s29, [#allocation7], %s1466_s10, %s1466_s10, %s1467_s11  }
  0x21   : > { %p28_p2 = scmp.eq.s32.totalorder %s27_s8, 0  ;;  %p37_p9 = scmp.ne.s32.totalorder %s1459_s22, %s1455_s21 }
  0x22   : > { %p38_p10 = scmp.eq.s32.totalorder %s1463_s23, 0  ;;  %p1286_p12 = scmp.lt.s32.totalorder %s1463_s23, 2 }
  0x23   : > { %s1582_s14 = scalar_select %p28_p2, %s1459_s22, %s30_s7  }
  0x24   : > { %p39_p13 = por %p38_p10, %p37_p9  ;;  %p1940_p0 = scmp.eq.s32.totalorder %s1529_s4, 1 }
  0x25   : > { %s199_s16 = sand.u32 1, %s1459_s22   ;;  %s1239_s17 = sshll.u32 %s1463_s23, 11 }
  0x26   : > { %p1586_p3 = por %p1940_p0, %p37_p9  ;;  %s1218_s18 = sshll.u32 %s199_s16, 7 }
  0x27   : > { %s1595_s28 = scalar_lea.hbm %s1926_s0, %s1239_s17  ;;  %s203_s29 = scalar_lea.vmem [#allocation3], %s1218_s18 }
  0x28   : > { %s1941_s15 = scalar_select %p1586_p3, 1, 0 }
  0x29   : > { %s211_s30 = sshll.u32 %s203_s29, 4  ;;  %p1597_p11 = pnand %p1286_p12, %p39_p13  ;;  %s1601_s30 = int_to_ptr.vmem [resolvable:$true] %s211_s30 }
  0x2a   : > { %s1603_s8 = scalar_lea.sflag [#allocation4], %s199_s16  ;;  %s1367_s9 = scalar_lea.hbm %s1595_s28, 2048 }
  0x2b   : > { %p1368_p5 = scmp.ne.s32.totalorder %s1595_s28, %s1367_s9  ;;  %p1369_p7 = pneg %p1597_p11 }
  0x2c   : > { %s1372_s17 = scalar_lea.hbm %s1926_s0, 4096  ;;  %p1373_p10 = scmp.lt.s32.totalorder %s1595_s28, %s1926_s0 }
  0x2d   : > { %p1370_p2 = pnand %p1369_p7, %p1368_p5  ;;  %p1374_p12 = scmp.lt.s32.totalorder %s1372_s17, %s1367_s9 }
  0x2f   : > { %p1371_p9 = pneg %p1370_p2  ;;  %p1375_p13 = por %p1374_p12, %p1373_p10 }
  0x31   : > { %p1376_p0 = pnand %p1375_p13, %p1371_p9 }
  0x33   : > { %1379 = shalt.err (!%p1376_p0)
}
  0x34   : > { %s1380_s16 = scalar_lea.vmem %s1601_s30, 2048  ;;  %s1468_s24 = smov [#allocation3]  }
  0x35   : > { %p1381_p1 = scmp.ne.s32.totalorder %s1601_s30, %s1380_s16  ;;  %s1385_s29 = sshll.u32 %s1468_s24, 4  ;;  %s1386_s29 = int_to_ptr.vmem [resolvable:$false] %s1385_s29 }
  0x36   : > { %s1387_s12 = scalar_lea.vmem %s1386_s29, 4096  ;;  %p1388_p2 = scmp.lt.s32.totalorder %s1601_s30, %s1386_s29 }
  0x37   : > { %p1383_p6 = pnand %p1381_p1, %p1369_p7  ;;  %p1389_p3 = scmp.lt.s32.totalorder %s1387_s12, %s1380_s16 }
  0x39   : > { %p1384_p5 = pneg %p1383_p6  ;;  %p1390_p4 = por %p1389_p3, %p1388_p2 }
  0x3b   : > { %p1391_p8 = pnand %p1390_p4, %p1384_p5 }
  0x3d   : > { %1394 = shalt.err (!%p1391_p8)
}
  0x3e   : > { %1280 = dma.hbm_to_vmem [thread:$0]  (!%p1597_p11), %s1595_s28, 2048, %s1601_s30, %s1603_s8, %s1466_s10, %s1466_s10, %s1467_s11  }
  0x3f   : > { %p1943_p1 = scmp.ne.s32.totalorder %s1938_s27, 0 }
  0x40   : > { %s1630_s9 = sand.u32 (!%p1943_p1), 1, %s1455_s21   ;;  %p1944_p4 = scmp.ne.s32.totalorder (!%p1943_p1), %s1936_s25, 0 }
  0x41   : > { %223 = sbr.rel (%p1943_p1) target bundleno = 1089 (0x441), region = 40  ;;  %s1223_s13 = sshll.u32 (!%p1943_p1), %s1630_s9, 7 }
  0x42   : > { %s226_s17 = scalar_lea.sflag (!%p1943_p1), [#allocation4], %s1630_s9  ;;  %s229_s7 = scalar_lea.vmem (!%p1943_p1), [#allocation3], %s1223_s13 }
  0x46   : > { %1438 = dma.done.wait (%p1944_p4), %s226_s17, 2048  }
  0x47   : > { %1440 = vsyncadd (%p1944_p4), %s226_s17, 4294965248  ;;  %p1945_p6 = scmp.eq.s32.totalorder %s1529_s4, 0 }
  0x49   : > { %1442 = dma.done.wait (%p1945_p6), [#allocation7], 16384   ;;  %p1946_p8 = pmov %p1945_p6 }
  0x4a   : > { %v1644_v0 = vld [vmem:[%s229_s7 + $0x40] sm:$0xff]  ;;  %v1646_v1 = vld [vmem:[%s229_s7 + $0x48] sm:$0xff]  ;;  %v1654_v5 = vld [vmem:[%s229_s7 + $0x50] sm:$0xff]  ;;  %v1469_v32 = vmov 0.0   ;;  %vm1470_vm0 = vmmov 0   ;;  %v342_v42 = vlaneseq  ;;  %vm353_vm1 = vcmask 130112  }
  0x4b   : > { %1444 = vsyncadd (%p1946_p8), [#allocation7], 4294950912  ;;  %v1648_v2 = vld [vmem:[%s229_s7] sm:$0xff]  ;;  %v290_v3 = vadd.f32 %v1646_v1, %v1644_v0  ;;  %v1652_v4 = vld [vmem:[%s229_s7 + $0x8] sm:$0xff]  ;;  %v322_v27 = vmax.f32 %v1644_v0, %v1646_v1  ;;  %1249 = vmatprep.subr.mxu0 %v1469_v32  ;;  %1260 = vmatprep.subr.mxu1 %v1469_v32  ;;  %vm360_vm2 = vcmask 195712   ;;  %vm367_vm3 = vcmask 261312  }
  0x4c   : > { %v1656_v6 = vld [vmem:[%s229_s7 + $0x58] sm:$0xff]  ;;  %v278_v7 = vadd.f32 %v1652_v4, %v1648_v2  ;;  %v1660_v8 = vld [vmem:[%s229_s7 + $0x10] sm:$0xff]  ;;  %v1668_v12 = vld [vmem:[%s229_s7 + $0x60] sm:$0xff]  ;;  %v310_v25 = vmax.f32 %v1648_v2, %v1652_v4  ;;  %1257 = vmatprep.mubr.msk.f32.mxu0 %vm1470_vm0, %v1469_v32  ;;  %1262 = vmatprep.mubr.msk.f32.mxu1 %vm1470_vm0, %v1469_v32  ;;  %v343_v45 = vand.u32 127, %v342_v42  ;;  %v1720_v47 = vshrl.u32 %v342_v42, 7  ;;  %s883_s24 = sld [smem:[#allocation2]] }
  0x4d   : > { %v1662_v9 = vld [vmem:[%s229_s7 + $0x18] sm:$0xff]  ;;  %291 = vadd.xlane.f32.xlu1 %v290_v3  ;;  %v293_v10 = vadd.f32 %v1656_v6, %v1654_v5  ;;  %v1670_v13 = vld [vmem:[%s229_s7 + $0x68] sm:$0xff]  ;;  %v1672_v14 = vld [vmem:[%s229_s7 + $0x20] sm:$0xff]  ;;  %v325_v26 = vmax.f32 %v1654_v5, %v1656_v6  ;;  %vm388_vm4 = vcmask 1041409   ;;  %vm437_vm5 = vcmask 1043459   ;;  %s1241_s29 = sshll.u32 %s1529_s4, 11 }
  0x4e   : > { %279 = vadd.xlane.f32.xlu0 %v278_v7  ;;  %v281_v11 = vadd.f32 %v1662_v9, %v1660_v8  ;;  %v1674_v15 = vld [vmem:[%s229_s7 + $0x28] sm:$0xff]  ;;  %v296_v16 = vadd.f32 %v1670_v13, %v1668_v12  ;;  %v1680_v18 = vld [vmem:[%s229_s7 + $0x70] sm:$0xff]  ;;  %v1682_v19 = vld [vmem:[%s229_s7 + $0x78] sm:$0xff]  ;;  %v313_v24 = vmax.f32 %v1660_v8, %v1662_v9  ;;  %v328_v28 = vmax.f32 %v1668_v12, %v1670_v13  ;;  %s1845_s12 = scalar_lea.vmem [#allocation8], %s1223_s13  ;;  %s1117_s25 = scalar_lea.sflag [#allocation5], %s1630_s9 }
  0x4f   : > { %v284_v17 = vadd.f32 %v1674_v15, %v1672_v14  ;;  %v1684_v20 = vld [vmem:[%s229_s7 + $0x30] sm:$0xff]  ;;  %v1686_v21 = vld [vmem:[%s229_s7 + $0x38] sm:$0xff]  ;;  %v299_v22 = vadd.f32 %v1682_v19, %v1680_v18  ;;  %v316_v29 = vmax.f32 %v1672_v14, %v1674_v15  ;;  %v331_v30 = vmax.f32 %v1680_v18, %v1682_v19  ;;  %v443_v35 = vld [vmem:[%s1927_s1 + $0x8] sm:$0xff]  ;;  %s1131_s17 = sshll.u32 %s1845_s12, 4  ;;  %s1869_s7 = scalar_lea.hbm %s1931_s5, %s1241_s29  ;;  %s1871_s17 = int_to_ptr.vmem [resolvable:$true] %s1131_s17 }
  0x50   : > { %v287_v23 = vadd.f32 %v1686_v21, %v1684_v20  ;;  %v319_v31 = vmax.f32 %v1684_v20, %v1686_v21  ;;  %v445_v33 = vld [vmem:[%s1927_s1 + $0x18] sm:$0xff]  ;;  %v444_v34 = vld [vmem:[%s1927_s1 + $0x10] sm:$0xff]  ;;  %v442_v36 = vld [vmem:[%s1927_s1] sm:$0xff]  ;;  %v348_v48 = vadd.s32 4294967288, %v343_v45  ;;  %v355_v49 = vadd.s32 4294967280, %v343_v45  ;;  %s1395_s27 = scalar_lea.vmem %s1871_s17, 2048 }
  0x51   : > { %294 = vadd.xlane.f32.xlu1 %v293_v10  ;;  %1250 = vmatpush3.msra.mxu0 %v445_v33  ;;  %v362_v51 = vadd.s32 4294967272, %v343_v45  ;;  %v346_v53 = vsub.s32 %v343_v45, %v1720_v47  ;;  %vm440_vm6 = vcmask 1041408   ;;  %vm446_vm7 = vcmask 261120   ;;  %p1396_p3 = scmp.ne.s32.totalorder %s1871_s17, %s1395_s27  ;;  %p1947_p11 = scmp.ne.s32.totalorder %s1941_s15, 0 }
  0x52   : > { %282 = vadd.xlane.f32.xlu0 %v281_v11  ;;  %1251 = vmatprep.subr.mxu0 %v1469_v32  ;;  %v351_v54 = vsub.s32 %v348_v48, %v1720_v47  ;;  %v358_v56 = vsub.s32 %v355_v49, %v1720_v47  ;;  %vm522_vm8 = vcmask 15360   ;;  %s1472_s10 = smov [#allocation8]  }
  0x53   : > { %1252 = vmatpush3.msra.mxu0 %v444_v34  ;;  %v365_v63 = vsub.s32 %v362_v51, %v1720_v47  ;;  %p1397_p7 = pnand %p1396_p3, %p1947_p11  ;;  %s1399_s11 = sshll.u32 %s1472_s10, 4  ;;  %s1400_s11 = int_to_ptr.vmem [resolvable:$false] %s1399_s11 }
  0x54   : > { %1253 = vmatprep.subr.mxu0 %v1469_v32  ;;  %s1401_s28 = scalar_lea.vmem %s1400_s11, 4096  ;;  %p1402_p10 = scmp.lt.s32.totalorder %s1871_s17, %s1400_s11 }
  0x55   : > { %297 = vadd.xlane.f32.xlu1 %v296_v16  ;;  %1254 = vmatpush3.msra.mxu0 %v443_v35  ;;  %p1398_p9 = pneg %p1397_p7  ;;  %p1403_p12 = scmp.lt.s32.totalorder %s1401_s28, %s1395_s27 }
  0x56   : > { %285 = vadd.xlane.f32.xlu0 %v284_v17  ;;  %1255 = vmatprep.subr.mxu0 %v1469_v32 }
  0x57   : > { %1256 = vmatpush3.msra.mxu0 %v442_v36  ;;  %p1404_p13 = por %p1403_p12, %p1402_p10 }
  0x59   : > { %300 = vadd.xlane.f32.xlu1 %v299_v22  ;;  %p1405_p0 = pnand %p1404_p13, %p1398_p9 }
  0x5a   : > { %288 = vadd.xlane.f32.xlu0 %v287_v23 }
  0x5d   : > { %314 = vmax.xlane.f32.xlu1 %v313_v24 }
  0x5e   : > { %311 = vmax.xlane.f32.xlu0 %v310_v25 }
  0x61   : > { %326 = vmax.xlane.f32.xlu1 %v325_v26 }
  0x62   : > { %323 = vmax.xlane.f32.xlu0 %v322_v27 }
  0x65   : > { %329 = vmax.xlane.f32.xlu1 %v328_v28 }
  0x66   : > { %317 = vmax.xlane.f32.xlu0 %v316_v29 }
  0x69   : > { %332 = vmax.xlane.f32.xlu1 %v331_v30 }
  0x6a   : > { %320 = vmax.xlane.f32.xlu0 %v319_v31 }
  0xd6   : > { %v292_v37 = vpop.xlane.xlu1 %291 }
  0xd7   : > { %v280_v38 = vpop.xlane.xlu0 %279  ;;  %v306_v57 = vmul.f32 0.00390625, %v292_v37 }
  0xd8   : > { %v302_v58 = vmul.f32 0.00390625, %v280_v38 }
  0xd9   : > { %v372_v16 = vrot.slane %v306_v57, %v346_v53 }
  0xda   : > { %v295_v39 = vpop.xlane.xlu1 %294  ;;  %v347_v17 = vrot.slane %v302_v58, %v346_v53 }
  0xdb   : > { %v283_v40 = vpop.xlane.xlu0 %282  ;;  %v307_v55 = vmul.f32 0.00390625, %v295_v39 }
  0xdc   : > { %v303_v59 = vmul.f32 0.00390625, %v283_v40 }
  0xdd   : > { %v376_v11 = vrot.slane %v307_v55, %v351_v54  ;;  %v521_v55 = vld [vmem:[%s1928_s2] sm:$0x3] }
  0xde   : > { %v298_v41 = vpop.xlane.xlu1 %297  ;;  %v352_v22 = vrot.slane %v303_v59, %v351_v54  ;;  %1261 = vmatpush3.msk.msra.mxu1 %vm440_vm6, %v521_v55  ;;  %v850_v59 = vld [vmem:[#allocation6 + $0x2f8] sm:$0xff]  ;;  %v765_v55 = vld [vmem:[#allocation6 + $0x50] sm:$0xff] }
  0xdf   : > { %v286_v43 = vpop.xlane.xlu0 %285  ;;  %v308_v60 = vmul.f32 0.00390625, %v298_v41  ;;  %v377_v34 = vsel %vm353_vm1, %v376_v11, %v372_v16  ;;  %956 = vmatprep.subr.mxu0 %v850_v59  ;;  %v783_v11 = vld [vmem:[#allocation6 + $0xe0] sm:$0xff]  ;;  %v845_v16 = vld [vmem:[#allocation6 + $0x2d0] sm:$0xff] }
  0xe0   : > { %v304_v62 = vmul.f32 0.00390625, %v286_v43  ;;  %v354_v36 = vsel %vm353_vm1, %v352_v22, %v347_v17  ;;  %v782_v17 = vld [vmem:[#allocation6 + $0xd8] sm:$0xff]  ;;  %v844_v22 = vld [vmem:[#allocation6 + $0x2c8] sm:$0xff]  ;;  %v763_v59 = vld [vmem:[#allocation6 + $0x40] sm:$0xff] }
  0xe1   : > { %v381_v23 = vrot.slane %v308_v60, %v358_v56  ;;  %v849_v60 = vld [vmem:[#allocation6 + $0x2f0] sm:$0xff] }
  0xe2   : > { %v301_v44 = vpop.xlane.xlu1 %300  ;;  %v359_v25 = vrot.slane %v304_v62, %v358_v56  ;;  %v848_v62 = vld [vmem:[#allocation6 + $0x2e8] sm:$0xff] }
  0xe3   : > { %v289_v46 = vpop.xlane.xlu0 %288  ;;  %v309_v3 = vmul.f32 0.00390625, %v301_v44  ;;  %v382_v37 = vsel %vm360_vm2, %v381_v23, %v377_v34  ;;  %v781_v23 = vld [vmem:[#allocation6 + $0xd0] sm:$0xff]  ;;  %v775_v34 = vld [vmem:[#allocation6 + $0xa0] sm:$0xff] }
  0xe4   : > { %v305_v10 = vmul.f32 0.00390625, %v289_v46  ;;  %v361_v39 = vsel %vm360_vm2, %v359_v25, %v354_v36  ;;  %v843_v25 = vld [vmem:[#allocation6 + $0x2c0] sm:$0xff]  ;;  %v774_v36 = vld [vmem:[#allocation6 + $0x98] sm:$0xff] }
  0xe5   : > { %v386_v26 = vrot.slane %v309_v3, %v365_v63  ;;  %v847_v3 = vld [vmem:[#allocation6 + $0x2e0] sm:$0xff] }
  0xe6   : > { %v315_v50 = vpop.xlane.xlu1 %314  ;;  %v366_v30 = vrot.slane %v305_v10, %v365_v63  ;;  %v846_v10 = vld [vmem:[#allocation6 + $0x2d8] sm:$0xff] }
  0xe7   : > { %v312_v52 = vpop.xlane.xlu0 %311  ;;  %v406_v31 = vrot.slane %v315_v50, %v351_v54  ;;  %v387_v40 = vsel %vm367_vm3, %v386_v26, %v382_v37  ;;  %v779_v26 = vld [vmem:[#allocation6 + $0xc0] sm:$0xff]  ;;  %v837_v37 = vld [vmem:[#allocation6 + $0x290] sm:$0xff] }
  0xe8   : > { %v402_v32 = vrot.slane %v312_v52, %v346_v53  ;;  %v368_v44 = vsel %vm367_vm3, %v366_v30, %v361_v39  ;;  %v777_v30 = vld [vmem:[#allocation6 + $0xb0] sm:$0xff]  ;;  %v836_v39 = vld [vmem:[#allocation6 + $0x288] sm:$0xff] }
  0xe9   : > { %v389_v52 = vsel %vm388_vm4, %v387_v40, %v368_v44  ;;  %v772_v40 = vld [vmem:[#allocation6 + $0x88] sm:$0xff]  ;;  %v770_v44 = vld [vmem:[#allocation6 + $0x78] sm:$0xff] }
  0xea   : > { %v327_v61 = vpop.xlane.xlu1 %326  ;;  %v407_v45 = vsel %vm353_vm1, %v406_v31, %v402_v32  ;;  %v840_v31 = vld [vmem:[#allocation6 + $0x2a8] sm:$0xff] }
  0xeb   : > { %v324_v7 = vpop.xlane.xlu0 %323  ;;  %v425_v27 = vrot.slane %v327_v61, %v351_v54  ;;  %v786_v61 = vld [vmem:[#allocation6 + $0xf8] sm:$0xff]  ;;  %v776_v32 = vld [vmem:[#allocation6 + $0xa8] sm:$0xff] }
  0xec   : > { %v421_v28 = vrot.slane %v324_v7, %v346_v53  ;;  %885 = vmatprep.subr.mxu1 %v786_v61  ;;  %v784_v7 = vld [vmem:[#allocation6 + $0xe8] sm:$0xff]  ;;  %v762_v61 = vld [vmem:[#allocation6 + $0x38] sm:$0xff] }
  0xee   : > { %v330_v24 = vpop.xlane.xlu1 %329  ;;  %v426_v41 = vsel %vm353_vm1, %v425_v27, %v421_v28  ;;  %v842_v27 = vld [vmem:[#allocation6 + $0x2b8] sm:$0xff] }
  0xef   : > { %v318_v29 = vpop.xlane.xlu0 %317  ;;  %v430_v33 = vrot.slane %v330_v24, %v358_v56  ;;  %v780_v24 = vld [vmem:[#allocation6 + $0xc8] sm:$0xff]  ;;  %v778_v28 = vld [vmem:[#allocation6 + $0xb8] sm:$0xff] }
  0xf0   : > { %v411_v35 = vrot.slane %v318_v29, %v358_v56  ;;  %v841_v29 = vld [vmem:[#allocation6 + $0x2b0] sm:$0xff] }
  0xf1   : > { %v431_v46 = vsel %vm360_vm2, %v430_v33, %v426_v41  ;;  %v839_v33 = vld [vmem:[#allocation6 + $0x2a0] sm:$0xff] }
  0xf2   : > { %v333_v38 = vpop.xlane.xlu1 %332  ;;  %v412_v49 = vsel %vm360_vm2, %v411_v35, %v407_v45  ;;  %v838_v35 = vld [vmem:[#allocation6 + $0x298] sm:$0xff]  ;;  %v835_v41 = vld [vmem:[#allocation6 + $0x280] sm:$0xff]  ;;  %v833_v45 = vld [vmem:[#allocation6 + $0x270] sm:$0xff] }
  0xf3   : > { %v435_v42 = vrot.slane %v333_v38, %v365_v63  ;;  %v321_v43 = vpop.xlane.xlu0 %320  ;;  %v773_v38 = vld [vmem:[#allocation6 + $0x90] sm:$0xff] }
  0xf4   : > { %v416_v48 = vrot.slane %v321_v43, %v365_v63  ;;  %v785_v63 = vld [vmem:[#allocation6 + $0xf0] sm:$0xff]  ;;  %v834_v43 = vld [vmem:[#allocation6 + $0x278] sm:$0xff] }
  0xf5   : > { %v436_v50 = vsel %vm367_vm3, %v435_v42, %v431_v46  ;;  %v771_v42 = vld [vmem:[#allocation6 + $0x80] sm:$0xff]  ;;  %v769_v46 = vld [vmem:[#allocation6 + $0x70] sm:$0xff] }
  0xf6   : > { %v417_v51 = vsel %vm367_vm3, %v416_v48, %v412_v49  ;;  %v832_v48 = vld [vmem:[#allocation6 + $0x268] sm:$0xff] }
  0xf7   : > { %v438_v53 = vsel %vm437_vm5, %v436_v50, %v417_v51  ;;  %v768_v49 = vld [vmem:[#allocation6 + $0x68] sm:$0xff]  ;;  %v831_v50 = vld [vmem:[#allocation6 + $0x260] sm:$0xff] }
  0xf8   : > { %v441_v54 = vsel %vm440_vm6, %v389_v52, %v438_v53  ;;  %v767_v51 = vld [vmem:[#allocation6 + $0x60] sm:$0xff]  ;;  %v830_v52 = vld [vmem:[#allocation6 + $0x258] sm:$0xff] }
  0xf9   : > { %1258 = vmatmul.mubr.msk.f32.vlgmr.msra.gmra.mxu0 %vm446_vm7, %v441_v54  ;;  %v766_v53 = vld [vmem:[#allocation6 + $0x58] sm:$0xff]  ;;  %v829_v54 = vld [vmem:[#allocation6 + $0x250] sm:$0xff] }
  0xfa   : > { %957 = vmatpush1.msra.mxu0 %v849_v60  ;;  %v826_v60 = vld [vmem:[#allocation6 + $0x238] sm:$0xff] }
  0xfb   : > { %958 = vmatprep.subr.mxu0 %v848_v62  ;;  %v825_v62 = vld [vmem:[#allocation6 + $0x230] sm:$0xff] }
  0xfc   : > { %959 = vmatpush1.msra.mxu0 %v847_v3  ;;  %v824_v3 = vld [vmem:[#allocation6 + $0x228] sm:$0xff] }
  0xfd   : > { %960 = vmatprep.subr.mxu0 %v846_v10  ;;  %v823_v10 = vld [vmem:[#allocation6 + $0x220] sm:$0xff] }
  0xfe   : > { %961 = vmatpush1.msra.mxu0 %v845_v16  ;;  %v822_v16 = vld [vmem:[#allocation6 + $0x218] sm:$0xff] }
  0xff   : > { %962 = vmatprep.subr.mxu0 %v844_v22 }
 0x100   : > { %963 = vmatpush1.msra.mxu0 %v843_v25 }
 0x101   : > { %964 = vmatprep.subr.mxu0 %v842_v27 }
 0x102   : > { %965 = vmatpush1.msra.mxu0 %v841_v29  ;;  %v758_v29 = vld [vmem:[#allocation6 + $0x18] sm:$0xff] }
 0x103   : > { %966 = vmatprep.subr.mxu0 %v840_v31  ;;  %v757_v31 = vld [vmem:[#allocation6 + $0x10] sm:$0xff] }
 0x104   : > { %967 = vmatpush1.msra.mxu0 %v839_v33  ;;  %v756_v33 = vld [vmem:[#allocation6 + $0x8] sm:$0xff] }
 0x105   : > { %968 = vmatprep.subr.mxu0 %v838_v35  ;;  %v755_v35 = vld [vmem:[#allocation6] sm:$0xff] }
 0x106   : > { %969 = vmatpush1.msra.mxu0 %v837_v37  ;;  %v818_v37 = vld [vmem:[#allocation6 + $0x1f8] sm:$0xff] }
 0x107   : > { %970 = vmatprep.subr.mxu0 %v836_v39  ;;  %v817_v39 = vld [vmem:[#allocation6 + $0x1f0] sm:$0xff] }
 0x108   : > { %971 = vmatpush1.msra.mxu0 %v835_v41  ;;  %v816_v41 = vld [vmem:[#allocation6 + $0x1e8] sm:$0xff] }
 0x109   : > { %972 = vmatprep.subr.mxu0 %v834_v43  ;;  %v815_v43 = vld [vmem:[#allocation6 + $0x1e0] sm:$0xff] }
 0x10a   : > { %973 = vmatpush1.msra.mxu0 %v833_v45  ;;  %v1744_v45 = vsub.s32 0, %v1720_v47 }
 0x10b   : > { %974 = vmatprep.subr.mxu0 %v832_v48  ;;  %v876_v48 = vld [vmem:[#allocation6 + $0x3c8] sm:$0xff] }
 0x10c   : > { %975 = vmatpush1.msra.mxu0 %v831_v50  ;;  %v875_v50 = vld [vmem:[#allocation6 + $0x3c0] sm:$0xff] }
 0x10d   : > { %976 = vmatprep.subr.mxu0 %v830_v52  ;;  %v812_v52 = vld [vmem:[#allocation6 + $0x1c8] sm:$0xff] }
 0x10e   : > { %977 = vmatpush1.msra.mxu0 %v829_v54 }
 0x1b9   : > { %v516_v56 = vpop.f32.mrf.mxu0 }
 0x1ba   : > { %v520_v57 = vmax.f32 %v516_v56, 0.0  ;;  %v828_v56 = vld [vmem:[#allocation6 + $0x248] sm:$0xff] }
 0x1bb   : > { %v1259_v58 = vpop.f32.mrf.mxu0  ;;  %978 = vmatprep.subr.mxu0 %v828_v56  ;;  %v811_v56 = vld [vmem:[#allocation6 + $0x1c0] sm:$0xff] }
 0x1bc   : > { %1263 = vmatmul.mubr.msk.f32.vlgmr.msra.gmra.mxu1 %vm522_vm8, %v520_v57  ;;  %v764_v57 = vld [vmem:[#allocation6 + $0x48] sm:$0xff]  ;;  %v827_v58 = vld [vmem:[#allocation6 + $0x240] sm:$0xff] }
 0x1bd   : > { %886 = vmatpush1.msra.mxu1 %v785_v63  ;;  %v761_v63 = vld [vmem:[#allocation6 + $0x30] sm:$0xff]  ;;  %979 = vmatpush1.msra.mxu0 %v827_v58  ;;  %v810_v58 = vld [vmem:[#allocation6 + $0x1b8] sm:$0xff] }
 0x1be   : > { %887 = vmatprep.subr.mxu1 %v784_v7  ;;  %v760_v7 = vld [vmem:[#allocation6 + $0x28] sm:$0xff]  ;;  %980 = vmatprep.subr.mxu0 %v826_v60  ;;  %v809_v60 = vld [vmem:[#allocation6 + $0x1b0] sm:$0xff] }
 0x1bf   : > { %888 = vmatpush1.msra.mxu1 %v783_v11  ;;  %v759_v11 = vld [vmem:[#allocation6 + $0x20] sm:$0xff]  ;;  %981 = vmatpush1.msra.mxu0 %v825_v62  ;;  %v808_v62 = vld [vmem:[#allocation6 + $0x1a8] sm:$0xff] }
 0x1c0   : > { %889 = vmatprep.subr.mxu1 %v782_v17  ;;  %982 = vmatprep.subr.mxu0 %v824_v3  ;;  %v821_v17 = vld [vmem:[#allocation6 + $0x210] sm:$0xff] }
 0x1c1   : > { %890 = vmatpush1.msra.mxu1 %v781_v23  ;;  %983 = vmatpush1.msra.mxu0 %v823_v10  ;;  %v869_v10 = vld [vmem:[#allocation6 + $0x390] sm:$0xff] }
 0x1c2   : > { %891 = vmatprep.subr.mxu1 %v780_v24  ;;  %984 = vmatprep.subr.mxu0 %v822_v16  ;;  %v868_v16 = vld [vmem:[#allocation6 + $0x388] sm:$0xff] }
 0x1c3   : > { %892 = vmatpush1.msra.mxu1 %v779_v26  ;;  %985 = vmatpush1.msra.mxu0 %v821_v17  ;;  %v805_v17 = vld [vmem:[#allocation6 + $0x190] sm:$0xff] }
 0x1c4   : > { %893 = vmatprep.subr.mxu1 %v778_v28 }
 0x1c5   : > { %894 = vmatpush1.msra.mxu1 %v777_v30  ;;  %v820_v30 = vld [vmem:[#allocation6 + $0x208] sm:$0xff] }
 0x1c6   : > { %895 = vmatprep.subr.mxu1 %v776_v32  ;;  %986 = vmatprep.subr.mxu0 %v820_v30  ;;  %v819_v32 = vld [vmem:[#allocation6 + $0x200] sm:$0xff] }
 0x1c7   : > { %896 = vmatpush1.msra.mxu1 %v775_v34  ;;  %987 = vmatpush1.msra.mxu0 %v819_v32  ;;  %v882_v34 = vld [vmem:[#allocation6 + $0x3f8] sm:$0xff]  ;;  %v863_v30 = vld [vmem:[#allocation6 + $0x360] sm:$0xff] }
 0x1c8   : > { %897 = vmatprep.subr.mxu1 %v774_v36  ;;  %988 = vmatprep.subr.mxu0 %v882_v34  ;;  %v881_v36 = vld [vmem:[#allocation6 + $0x3f0] sm:$0xff]  ;;  %v862_v32 = vld [vmem:[#allocation6 + $0x358] sm:$0xff] }
 0x1c9   : > { %898 = vmatpush1.msra.mxu1 %v773_v38  ;;  %989 = vmatpush2.msra.mxu0 %v881_v36  ;;  %v880_v38 = vld [vmem:[#allocation6 + $0x3e8] sm:$0xff]  ;;  %v861_v34 = vld [vmem:[#allocation6 + $0x350] sm:$0xff] }
 0x1ca   : > { %899 = vmatprep.subr.mxu1 %v772_v40  ;;  %990 = vmatprep.subr.mxu0 %v880_v38  ;;  %v879_v40 = vld [vmem:[#allocation6 + $0x3e0] sm:$0xff]  ;;  %v860_v36 = vld [vmem:[#allocation6 + $0x348] sm:$0xff] }
 0x1cb   : > { %900 = vmatpush1.msra.mxu1 %v771_v42  ;;  %991 = vmatpush2.msra.mxu0 %v879_v40  ;;  %v878_v42 = vld [vmem:[#allocation6 + $0x3d8] sm:$0xff]  ;;  %v859_v38 = vld [vmem:[#allocation6 + $0x340] sm:$0xff] }
 0x1cc   : > { %901 = vmatprep.subr.mxu1 %v770_v44  ;;  %992 = vmatprep.subr.mxu0 %v878_v42  ;;  %v877_v44 = vld [vmem:[#allocation6 + $0x3d0] sm:$0xff]  ;;  %v858_v40 = vld [vmem:[#allocation6 + $0x338] sm:$0xff] }
 0x1cd   : > { %902 = vmatpush1.msra.mxu1 %v769_v46  ;;  %993 = vmatpush2.msra.mxu0 %v877_v44  ;;  %v814_v46 = vld [vmem:[#allocation6 + $0x1d8] sm:$0xff]  ;;  %v857_v42 = vld [vmem:[#allocation6 + $0x330] sm:$0xff]  ;;  %v856_v44 = vld [vmem:[#allocation6 + $0x328] sm:$0xff] }
 0x1ce   : > { %903 = vmatprep.subr.mxu1 %v768_v49  ;;  %994 = vmatprep.subr.mxu0 %v876_v48  ;;  %v813_v49 = vld [vmem:[#allocation6 + $0x1d0] sm:$0xff]  ;;  %v855_v48 = vld [vmem:[#allocation6 + $0x320] sm:$0xff] }
 0x1cf   : > { %904 = vmatpush1.msra.mxu1 %v767_v51  ;;  %995 = vmatpush2.msra.mxu0 %v875_v50  ;;  %v854_v50 = vld [vmem:[#allocation6 + $0x318] sm:$0xff] }
 0x1d0   : > { %905 = vmatprep.subr.mxu1 %v766_v53  ;;  %v874_v53 = vld [vmem:[#allocation6 + $0x3b8] sm:$0xff] }
 0x1d1   : > { %906 = vmatpush1.msra.mxu1 %v765_v55  ;;  %v1748_v55 = vsub.s32 1, %v1720_v47  ;;  %996 = vmatprep.subr.mxu0 %v874_v53  ;;  %v790_v53 = vld [vmem:[#allocation6 + $0x118] sm:$0xff] }
 0x1d2   : > { %907 = vmatprep.subr.mxu1 %v764_v57  ;;  %v873_v57 = vld [vmem:[#allocation6 + $0x3b0] sm:$0xff] }
 0x1d3   : > { %908 = vmatpush1.msra.mxu1 %v763_v59  ;;  %997 = vmatpush2.msra.mxu0 %v873_v57  ;;  %v872_v59 = vld [vmem:[#allocation6 + $0x3a8] sm:$0xff]  ;;  %v851_v57 = vld [vmem:[#allocation6 + $0x300] sm:$0xff] }
 0x1d4   : > { %909 = vmatprep.subr.mxu1 %v762_v61  ;;  %v871_v61 = vld [vmem:[#allocation6 + $0x3a0] sm:$0xff]  ;;  %998 = vmatprep.subr.mxu0 %v872_v59 }
 0x1d5   : > { %910 = vmatpush1.msra.mxu1 %v761_v63  ;;  %v870_v63 = vld [vmem:[#allocation6 + $0x398] sm:$0xff]  ;;  %999 = vmatpush2.msra.mxu0 %v871_v61  ;;  %v787_v59 = vld [vmem:[#allocation6 + $0x100] sm:$0xff] }
 0x1d6   : > { %911 = vmatprep.subr.mxu1 %v760_v7  ;;  %v807_v7 = vld [vmem:[#allocation6 + $0x1a0] sm:$0xff]  ;;  %1000 = vmatprep.subr.mxu0 %v870_v63 }
 0x1d7   : > { %912 = vmatpush1.msra.mxu1 %v759_v11  ;;  %v806_v11 = vld [vmem:[#allocation6 + $0x198] sm:$0xff]  ;;  %1001 = vmatpush2.msra.mxu0 %v869_v10 }
 0x1d8   : > { %913 = vmatprep.subr.mxu1 %v758_v29  ;;  %1002 = vmatprep.subr.mxu0 %v868_v16  ;;  %v801_v29 = vld [vmem:[#allocation6 + $0x170] sm:$0xff] }
 0x1d9   : > { %914 = vmatpush1.msra.mxu1 %v757_v31  ;;  %v800_v31 = vld [vmem:[#allocation6 + $0x168] sm:$0xff] }
 0x1da   : > { %915 = vmatprep.subr.mxu1 %v756_v33  ;;  %v799_v33 = vld [vmem:[#allocation6 + $0x160] sm:$0xff] }
 0x1db   : > { %916 = vmatpush1.msra.mxu1 %v755_v35  ;;  %v798_v35 = vld [vmem:[#allocation6 + $0x158] sm:$0xff] }
 0x1dc   : > { %917 = vmatprep.subr.mxu1 %v818_v37  ;;  %v797_v37 = vld [vmem:[#allocation6 + $0x150] sm:$0xff] }
 0x1dd   : > { %918 = vmatpush2.msra.mxu1 %v817_v39  ;;  %v796_v39 = vld [vmem:[#allocation6 + $0x148] sm:$0xff] }
 0x1de   : > { %919 = vmatprep.subr.mxu1 %v816_v41  ;;  %v795_v41 = vld [vmem:[#allocation6 + $0x140] sm:$0xff] }
 0x1df   : > { %920 = vmatpush2.msra.mxu1 %v815_v43  ;;  %v794_v43 = vld [vmem:[#allocation6 + $0x138] sm:$0xff] }
 0x1e0   : > { %921 = vmatprep.subr.mxu1 %v814_v46  ;;  %v793_v46 = vld [vmem:[#allocation6 + $0x130] sm:$0xff] }
 0x1e1   : > { %922 = vmatpush2.msra.mxu1 %v813_v49  ;;  %v792_v49 = vld [vmem:[#allocation6 + $0x128] sm:$0xff] }
 0x1e2   : > { %923 = vmatprep.subr.mxu1 %v812_v52  ;;  %v853_v52 = vld [vmem:[#allocation6 + $0x310] sm:$0xff] }
 0x1e3   : > { %924 = vmatpush2.msra.mxu1 %v811_v56  ;;  %v789_v56 = vld [vmem:[#allocation6 + $0x110] sm:$0xff] }
 0x1e4   : > { %925 = vmatprep.subr.mxu1 %v810_v58  ;;  %v788_v58 = vld [vmem:[#allocation6 + $0x108] sm:$0xff] }
 0x1e5   : > { %926 = vmatpush2.msra.mxu1 %v809_v60 }
 0x1e6   : > { %927 = vmatprep.subr.mxu1 %v808_v62 }
 0x1e7   : > { %928 = vmatpush2.msra.mxu1 %v807_v7 }
 0x1e8   : > { %929 = vmatprep.subr.mxu1 %v806_v11 }
 0x1e9   : > { %930 = vmatpush2.msra.mxu1 %v805_v17 }
 0x27c   : > { %v595_v22 = vpop.f32.mrf.mxu1 }
 0x27d   : > { %v600_v23 = vrot.slane %v595_v22, 2 }
 0x27e   : > { %v1264_v24 = vpop.f32.mrf.mxu1 }
 0x27f   : > { %v602_v25 = vadd.f32 %v600_v23, %v595_v22  ;;  %v867_v22 = vld [vmem:[#allocation6 + $0x380] sm:$0xff]  ;;  %v804_v23 = vld [vmem:[#allocation6 + $0x188] sm:$0xff]  ;;  %v866_v24 = vld [vmem:[#allocation6 + $0x378] sm:$0xff] }
 0x280   : > { %1003 = vmatpush2.msra.mxu0 %v867_v22  ;;  %931 = vmatprep.subr.mxu1 %v804_v23 }
 0x281   : > { %v1229_v26 = vmul.f32 -1.442695, %v602_v25  ;;  %v803_v25 = vld [vmem:[#allocation6 + $0x180] sm:$0xff]  ;;  %1004 = vmatprep.subr.mxu0 %v866_v24 }
 0x282   : > { %932 = vmatpush2.msra.mxu1 %v803_v25 }
 0x283   : > { %1329 = vpow2.f32 %v1229_v26  ;;  %v865_v26 = vld [vmem:[#allocation6 + $0x370] sm:$0xff] }
 0x284   : > { %1005 = vmatpush2.msra.mxu0 %v865_v26 }
 0x290   : > { %v1330_v27 = vpop.eup %1329 }
 0x291   : > { %v606_v28 = vadd.f32 1.0, %v1330_v27  ;;  %v802_v27 = vld [vmem:[#allocation6 + $0x178] sm:$0xff] }
 0x292   : > { %933 = vmatprep.subr.mxu1 %v802_v27 }
 0x293   : > { %1331 = vrcp.f32 %v606_v28  ;;  %v864_v28 = vld [vmem:[#allocation6 + $0x368] sm:$0xff]  ;;  %934 = vmatpush2.msra.mxu1 %v801_v29 }
 0x294   : > { %1006 = vmatprep.subr.mxu0 %v864_v28  ;;  %935 = vmatprep.subr.mxu1 %v800_v31 }
 0x295   : > { %1007 = vmatpush2.msra.mxu0 %v863_v30  ;;  %936 = vmatpush2.msra.mxu1 %v799_v33 }
 0x296   : > { %1008 = vmatprep.subr.mxu0 %v862_v32  ;;  %937 = vmatprep.subr.mxu1 %v798_v35 }
 0x297   : > { %1009 = vmatpush2.msra.mxu0 %v861_v34  ;;  %938 = vmatpush2.msra.mxu1 %v797_v37 }
 0x298   : > { %1010 = vmatprep.subr.mxu0 %v860_v36  ;;  %939 = vmatprep.subr.mxu1 %v796_v39 }
 0x299   : > { %1011 = vmatpush2.msra.mxu0 %v859_v38  ;;  %940 = vmatpush2.msra.mxu1 %v795_v41 }
 0x29a   : > { %1012 = vmatprep.subr.mxu0 %v858_v40  ;;  %941 = vmatprep.subr.mxu1 %v794_v43 }
 0x29b   : > { %1013 = vmatpush2.msra.mxu0 %v857_v42  ;;  %942 = vmatpush2.msra.mxu1 %v793_v46 }
 0x29c   : > { %1014 = vmatprep.subr.mxu0 %v856_v44  ;;  %943 = vmatprep.subr.mxu1 %v792_v49 }
 0x29d   : > { %1015 = vmatpush2.msra.mxu0 %v855_v48 }
 0x29e   : > { %1016 = vmatprep.subr.mxu0 %v854_v50 }
 0x29f   : > { %1017 = vmatpush2.msra.mxu0 %v853_v52 }
 0x2a0   : > { %v1332_v51 = vpop.eup %1331 }
 0x2a1   : > { %v612_v54 = vrot.slane %v1332_v51, %v1744_v45  ;;  %v631_v3 = vrot.slane %v1332_v51, %v1748_v55  ;;  %v791_v51 = vld [vmem:[#allocation6 + $0x120] sm:$0xff] }
 0x2a2   : > { %944 = vmatpush2.msra.mxu1 %v791_v51 }
 0x2a3   : > { %618 = vbcast.lane.b32.xlu1 %v612_v54, 264  ;;  %614 = vbcast.lane.b32.xlu0 %v612_v54, 256 }
 0x2a4   : > { %945 = vmatprep.subr.mxu1 %v790_v53 }
 0x2a5   : > { %946 = vmatpush2.msra.mxu1 %v789_v56 }
 0x2a6   : > { %947 = vmatprep.subr.mxu1 %v788_v58 }
 0x2a7   : > { %633 = vbcast.lane.b32.xlu1 %v631_v3, 256  ;;  %622 = vbcast.lane.b32.xlu0 %v612_v54, 272 }
 0x2a8   : > { %948 = vmatpush2.msra.mxu1 %v787_v59 }
 0x2ab   : > { %637 = vbcast.lane.b32.xlu1 %v631_v3, 264  ;;  %626 = vbcast.lane.b32.xlu0 %v612_v54, 280  ;;  %v852_v54 = vld [vmem:[#allocation6 + $0x308] sm:$0xff] }
 0x2ac   : > { %1018 = vmatprep.subr.mxu0 %v852_v54 }
 0x2ad   : > { %1019 = vmatpush2.msra.mxu0 %v851_v57 }
 0x2af   : > { %641 = vbcast.lane.b32.xlu1 %v631_v3, 272 }
 0x2b3   : > { %645 = vbcast.lane.b32.xlu1 %v631_v3, 280 }
 0x315   : > { %v619_v60 = vpop.permute.xlu1 %618  ;;  %v615_v61 = vpop.permute.xlu0 %614 }
 0x316   : > { %v1752_v62 = vmul.f32 %v619_v60, %v1660_v8  ;;  %v1755_v63 = vmul.f32 %v619_v60, %v1662_v9  ;;  %v1758_v3 = vmul.f32 %v615_v61, %v1648_v2  ;;  %v1761_v7 = vmul.f32 %v615_v61, %v1652_v4 }
 0x318   : > { %v663_v8 = vadd.f32 %v1752_v62, %v1758_v3  ;;  %v672_v9 = vadd.f32 %v1755_v63, %v1761_v7  ;;  %v703_v2 = vmax.f32 %v1758_v3, %v1752_v62  ;;  %v712_v4 = vmax.f32 %v1761_v7, %v1755_v63 }
 0x319   : > { %v634_v10 = vpop.permute.xlu1 %633  ;;  %v623_v11 = vpop.permute.xlu0 %622 }
 0x31a   : > { %v1764_v16 = vmul.f32 %v623_v11, %v1672_v14  ;;  %v1767_v17 = vmul.f32 %v623_v11, %v1674_v15 }
 0x31c   : > { %v664_v26 = vadd.f32 %v663_v8, %v1764_v16  ;;  %v673_v27 = vadd.f32 %v672_v9, %v1767_v17  ;;  %v704_v28 = vmax.f32 %v703_v2, %v1764_v16  ;;  %v713_v29 = vmax.f32 %v712_v4, %v1767_v17 }
 0x31d   : > { %v638_v22 = vpop.permute.xlu1 %637  ;;  %v627_v23 = vpop.permute.xlu0 %626 }
 0x31e   : > { %v1778_v14 = vmul.f32 %v638_v22, %v1654_v5  ;;  %v1781_v15 = vmul.f32 %v638_v22, %v1656_v6  ;;  %v1784_v24 = vmul.f32 %v627_v23, %v1684_v20  ;;  %v1787_v25 = vmul.f32 %v627_v23, %v1686_v21 }
 0x31f   : > { %v1794_v5 = vmul.f32 %v634_v10, %v1644_v0  ;;  %v1797_v6 = vmul.f32 %v634_v10, %v1646_v1 }
 0x320   : > { %v665_v20 = vadd.f32 %v664_v26, %v1784_v24  ;;  %v674_v30 = vadd.f32 %v673_v27, %v1787_v25  ;;  %v705_v21 = vmax.f32 %v704_v28, %v1784_v24  ;;  %v714_v31 = vmax.f32 %v713_v29, %v1787_v25 }
 0x321   : > { %v642_v32 = vpop.permute.xlu1 %641  ;;  %v681_v33 = vadd.f32 %v1778_v14, %v1794_v5  ;;  %v690_v34 = vadd.f32 %v1781_v15, %v1797_v6  ;;  %v721_v39 = vmax.f32 %v1794_v5, %v1778_v14  ;;  %v730_v40 = vmax.f32 %v1797_v6, %v1781_v15 }
 0x322   : > { %v1808_v0 = vmul.f32 %v642_v32, %v1668_v12  ;;  %v1811_v1 = vmul.f32 %v642_v32, %v1670_v13  ;;  %v666_v35 = vrot.slane %v665_v20, 4  ;;  %v675_v36 = vrot.slane %v674_v30, 4 }
 0x323   : > { %v706_v37 = vrot.slane %v705_v21, 4  ;;  %v715_v38 = vrot.slane %v714_v31, 4 }
 0x324   : > { %v682_v41 = vadd.f32 %v681_v33, %v1808_v0  ;;  %v691_v42 = vadd.f32 %v690_v34, %v1811_v1  ;;  %v667_v43 = vadd.f32 %v666_v35, %v665_v20  ;;  %v676_v12 = vadd.f32 %v675_v36, %v674_v30 }
 0x325   : > { %v707_v44 = vmax.f32 %v705_v21, %v706_v37  ;;  %v716_v46 = vmax.f32 %v714_v31, %v715_v38  ;;  %v646_v13 = vpop.permute.xlu1 %645  ;;  %v722_v48 = vmax.f32 %v721_v39, %v1808_v0  ;;  %v731_v49 = vmax.f32 %v730_v40, %v1811_v1 }
 0x326   : > { %v1822_v50 = vmul.f32 %v646_v13, %v1680_v18  ;;  %v1825_v51 = vmul.f32 %v646_v13, %v1682_v19  ;;  %v668_v52 = vrot.slane %v667_v43, 2  ;;  %v677_v53 = vrot.slane %v676_v12, 2 }
 0x327   : > { %v708_v54 = vrot.slane %v707_v44, 2  ;;  %v717_v56 = vrot.slane %v716_v46, 2 }
 0x328   : > { %v683_v57 = vadd.f32 %v682_v41, %v1822_v50  ;;  %v692_v58 = vadd.f32 %v691_v42, %v1825_v51  ;;  %v723_v59 = vmax.f32 %v722_v48, %v1822_v50  ;;  %v732_v60 = vmax.f32 %v731_v49, %v1825_v51 }
 0x329   : > { %v669_v61 = vadd.f32 %v668_v52, %v667_v43  ;;  %v678_v10 = vadd.f32 %v677_v53, %v676_v12  ;;  %v709_v19 = vmax.f32 %v707_v44, %v708_v54  ;;  %v718_v2 = vmax.f32 %v716_v46, %v717_v56 }
 0x32a   : > { %v684_v11 = vrot.slane %v683_v57, 4  ;;  %v693_v18 = vrot.slane %v692_v58, 4  ;;  %v724_v8 = vrot.slane %v723_v59, 4  ;;  %v733_v9 = vrot.slane %v732_v60, 4 }
 0x32b   : > { %v679_v27 = vrot.slane %v678_v10, 1  ;;  %v670_v28 = vrot.slane %v669_v61, 1  ;;  %v719_v31 = vrot.slane %v718_v2, 1  ;;  %v710_v32 = vrot.slane %v709_v19, 1 }
 0x32c   : > { %v685_v4 = vadd.f32 %v684_v11, %v683_v57  ;;  %v694_v22 = vadd.f32 %v693_v18, %v692_v58  ;;  %v725_v23 = vmax.f32 %v723_v59, %v724_v8  ;;  %v734_v26 = vmax.f32 %v732_v60, %v733_v9 }
 0x32d   : > { %v680_v37 = vadd.f32 %v679_v27, %v678_v10  ;;  %v671_v38 = vadd.f32 %v670_v28, %v669_v61  ;;  %v720_v43 = vmax.f32 %v718_v2, %v719_v31  ;;  %v711_v12 = vmax.f32 %v709_v19, %v710_v32 }
 0x32e   : > { %v686_v29 = vrot.slane %v685_v4, 2  ;;  %v695_v20 = vrot.slane %v694_v22, 2  ;;  %v726_v30 = vrot.slane %v725_v23, 2  ;;  %v735_v21 = vrot.slane %v734_v26, 2 }
 0x32f   : > { %v700_v49 = vmul.f32 0.03125, %v680_v37  ;;  %v699_v52 = vmul.f32 0.03125, %v671_v38  ;;  %v884_v60 = vstv %s883_s24 }
 0x330   : > { %v687_v33 = vadd.f32 %v686_v29, %v685_v4  ;;  %v727_v34 = vmax.f32 %v725_v23, %v726_v30  ;;  %v736_v35 = vmax.f32 %v734_v26, %v735_v21  ;;  %v696_v36 = vadd.f32 %v695_v20, %v694_v22 }
 0x331   : > { %v1471_v29 = vmov 1966171168  }
 0x332   : > { %v737_v39 = vrot.slane %v736_v35, 1  ;;  %v728_v40 = vrot.slane %v727_v34, 1  ;;  %v697_v41 = vrot.slane %v696_v36, 1  ;;  %v688_v42 = vrot.slane %v687_v33, 1 }
 0x333   : > { %v1043_v20 = vunpack.c.l.s4 %v1471_v29 }
 0x334   : > { %v738_v44 = vmax.f32 %v736_v35, %v737_v39  ;;  %v729_v46 = vmax.f32 %v727_v34, %v728_v40  ;;  %v698_v13 = vadd.f32 %v697_v41, %v696_v36  ;;  %v689_v48 = vadd.f32 %v688_v42, %v687_v33 }
 0x335   : > { %v1044_v30 = vunpack.c.0.s8 %v1043_v20 }
 0x336   : > { %v752_v53 = vsel %vm388_vm4, %v738_v44, %v720_v43  ;;  %v751_v54 = vsel %vm388_vm4, %v729_v46, %v711_v12  ;;  %v702_v56 = vmul.f32 0.03125, %v698_v13  ;;  %v701_v57 = vmul.f32 0.03125, %v689_v48 }
 0x337   : > { %1020 = vmatprep.mubr.f32.mxu0 %v752_v53  ;;  %v1047_v31 = vsub.s32 %v1044_v30, %v1720_v47 }
 0x338   : > { %1021 = vmatmul.mubr.f32.vlgmr.msra.gmra.mxu0 %v751_v54  ;;  %v744_v58 = vsel %vm388_vm4, %v702_v56, %v700_v49  ;;  %v743_v59 = vsel %vm388_vm4, %v701_v57, %v699_v52 }
 0x339   : > { %949 = vmatprep.mubr.f32.mxu1 %v744_v58 }
 0x33a   : > { %950 = vmatmul.mubr.f32.vlgmr.msra.gmra.mxu1 %v743_v59 }
 0x3f8   : > { %v1022_v61 = vpop.f32.mrf.mxu0 }
 0x3fa   : > { %v951_v10 = vpop.f32.mrf.mxu1  ;;  %v1024_v19 = vpop.f32.mrf.mxu0 }
 0x3fb   : > { %v952_v11 = vadd.f32 %v951_v10, %v884_v60 }
 0x3fc   : > { %v953_v18 = vpop.f32.mrf.mxu1 }
 0x3fd   : > { %v1023_v8 = vadd.f32 %v1022_v61, %v952_v11  ;;  %v954_v9 = vadd.f32 %v953_v18, %v884_v60 }
 0x3ff   : > { %v1230_v2 = vmul.f32 -1.442695, %v1023_v8  ;;  %v1025_v4 = vadd.f32 %v1024_v19, %v954_v9 }
 0x401   : > { %1333 = vpow2.f32 %v1230_v2  ;;  %v1231_v22 = vmul.f32 -1.442695, %v1025_v4 }
 0x403   : > { %1335 = vpow2.f32 %v1231_v22 }
 0x40e   : > { %v1334_v23 = vpop.eup %1333 }
 0x40f   : > { %v1033_v26 = vadd.f32 1.0, %v1334_v23 }
 0x410   : > { %v1336_v27 = vpop.eup %1335 }
 0x411   : > { %v1034_v28 = vadd.f32 1.0, %v1336_v27  ;;  %1337 = vrcp.f32 %v1033_v26 }
 0x413   : > { %1339 = vrcp.f32 %v1034_v28 }
 0x41e   : > { %v1338_v21 = vpop.eup %1337 }
 0x420   : > { %v1340_v32 = vpop.eup %1339 }
 0x421   : > { %v1041_v33 = vcombine.low %v1338_v21, %v1340_v32 }
 0x423   : > { %v1048_v34 = vrot.slane %v1041_v33, %v1047_v31 }
 0x425   : > { %v1049_v35 = vcombine.high %v1048_v34, %v1048_v34  ;;  %v1056_v36 = vrot.slane %v1048_v34, %v1047_v31 }
 0x427   : > { %v1063_v37 = vrot.slane %v1049_v35, %v1047_v31  ;;  %v1067_v38 = vrot.slane %v1056_v36, %v1744_v45  ;;  %v1071_v39 = vrot.slane %v1056_v36, %v1748_v55 }
 0x429   : > { %v1075_v40 = vrot.slane %v1063_v37, %v1744_v45  ;;  %v1079_v41 = vrot.slane %v1063_v37, %v1748_v55  ;;  %v1084_v42 = vmul.f32 %v1067_v38, %v1758_v3  ;;  %v1085_v43 = vmul.f32 %v1071_v39, %v1761_v7 }
 0x42a   : > { %v1086_v47 = vmul.f32 %v1067_v38, %v1752_v62  ;;  %v1087_v45 = vmul.f32 %v1071_v39, %v1755_v63  ;;  %v1088_v55 = vmul.f32 %v1067_v38, %v1764_v16  ;;  %v1089_v3 = vmul.f32 %v1071_v39, %v1767_v17 }
 0x42b   : > { %v1090_v7 = vmul.f32 %v1067_v38, %v1784_v24  ;;  %v1091_v12 = vmul.f32 %v1071_v39, %v1787_v25  ;;  %v1092_v44 = vmul.f32 %v1075_v40, %v1794_v5  ;;  %v1093_v46 = vmul.f32 %v1079_v41, %v1797_v6  ;;  %1100 = vst [vmem:[%s1845_s12] sm:$0xff] %v1084_v42 }
 0x42c   : > { %1101 = vst [vmem:[%s1845_s12 + $0x8] sm:$0xff] %v1085_v43  ;;  %v1094_v62 = vmul.f32 %v1075_v40, %v1778_v14  ;;  %v1095_v63 = vmul.f32 %v1079_v41, %v1781_v15  ;;  %v1096_v16 = vmul.f32 %v1075_v40, %v1808_v0  ;;  %v1097_v17 = vmul.f32 %v1079_v41, %v1811_v1 }
 0x42d   : > { %1102 = vst [vmem:[%s1845_s12 + $0x10] sm:$0xff] %v1086_v47  ;;  %1103 = vst [vmem:[%s1845_s12 + $0x18] sm:$0xff] %v1087_v45  ;;  %v1098_v14 = vmul.f32 %v1075_v40, %v1822_v50  ;;  %v1099_v15 = vmul.f32 %v1079_v41, %v1825_v51 }
 0x42e   : > { %1104 = vst [vmem:[%s1845_s12 + $0x20] sm:$0xff] %v1088_v55  ;;  %1105 = vst [vmem:[%s1845_s12 + $0x28] sm:$0xff] %v1089_v3 }
 0x42f   : > { %1106 = vst [vmem:[%s1845_s12 + $0x30] sm:$0xff] %v1090_v7  ;;  %1107 = vst [vmem:[%s1845_s12 + $0x38] sm:$0xff] %v1091_v12 }
 0x430   : > { %1108 = vst [vmem:[%s1845_s12 + $0x40] sm:$0xff] %v1092_v44  ;;  %1109 = vst [vmem:[%s1845_s12 + $0x48] sm:$0xff] %v1093_v46 }
 0x431   : > { %1110 = vst [vmem:[%s1845_s12 + $0x50] sm:$0xff] %v1094_v62  ;;  %1111 = vst [vmem:[%s1845_s12 + $0x58] sm:$0xff] %v1095_v63 }
 0x432   : > { %1112 = vst [vmem:[%s1845_s12 + $0x60] sm:$0xff] %v1096_v16  ;;  %1113 = vst [vmem:[%s1845_s12 + $0x68] sm:$0xff] %v1097_v17 }
 0x433   : > { %1114 = vst [vmem:[%s1845_s12 + $0x70] sm:$0xff] %v1098_v14  ;;  %1115 = vst [vmem:[%s1845_s12 + $0x78] sm:$0xff] %v1099_v15 }
 0x434   : > { %1408 = shalt.err (!%p1405_p0)
}
 0x435   : > { %s1409_s30 = scalar_lea.hbm %s1869_s7, 2048  ;;  %s1413_s19 = scalar_lea.hbm %s1931_s5, 4096 }
 0x436   : > { %p1410_p5 = scmp.ne.s32.totalorder %s1869_s7, %s1409_s30  ;;  %p1414_p4 = scmp.lt.s32.totalorder %s1869_s7, %s1931_s5 }
 0x437   : > { %p1415_p6 = scmp.lt.s32.totalorder %s1413_s19, %s1409_s30 }
 0x438   : > { %p1411_p2 = pnand %p1410_p5, %p1947_p11 }
 0x439   : > { %p1416_p8 = por %p1415_p6, %p1414_p4 }
 0x43a   : > { %p1412_p1 = pneg %p1411_p2 }
 0x43c   : > { %p1417_p3 = pnand %p1416_p8, %p1412_p1 }
 0x43e   : > { %1420 = shalt.err (!%p1417_p3)
}
 0x43f   : > { %s1473_s29 = smov 256   ;;  %s1474_s12 = smov 16  }
 0x440   : > { %1271 = dma.vmem_to_hbm [thread:$0]  (%p1947_p11), %s1871_s17, 2048, %s1869_s7, %s1117_s25, %s1473_s29, %s1473_s29, %s1474_s12  }
 0x441 PF: > { %s1146_s4 = sand.u32 1, %s1451_s20   ;;  %p1948_p7 = scmp.ne.s32.totalorder %s1937_s26, 0 }
 0x442   : > { %p1949_p9 = scmp.ge.s32.totalorder %s1463_s23, 2  ;;  %s1147_s13 = scalar_lea.sflag [#allocation5], %s1146_s4 }
 0x444   : > { %p1282_p10 = pnand %p1949_p9, %p1948_p7 }
 0x446   : > { %p1283_p12 = pneg %p1282_p10 }
 0x448   : > { %1446 = dma.done.wait (%p1283_p12), %s1147_s13, 2048  }
 0x449   : > { %1448 = vsyncadd (%p1283_p12), %s1147_s13, 4294965248  ;;  %p20_p13 = scmp.ge.s32.totalorder %s1562_s6, 4   ;;  %s1950_s20 = smov %s1455_s21 }
 0x44a   : > { %s1951_s21 = smov %s1459_s22  ;;  %s1952_s22 = smov %s1582_s14 }
 0x44b   : > { %s1953_s23 = smov %s1562_s6  ;;  %22 = sbr.rel (!%p20_p13) target bundleno = 8 (0x8), region = 89 }
 0x450   :  { %1152 = vsyncpa [#allocation4], 1 }
 0x451   :  { %1154 = vsyncpa [#allocation4 + $0x1], 1 }
 0x452   :  { %1155 = vsyncpa [#allocation7], 1 }
 0x453   :  { %1156 = vsyncpa [#allocation5], 1 }
 0x454   :  { %1158 = vsyncpa [#allocation5 + $0x1], 1 }

</bundles_post_ra>
